<compile_context>
chip_gen: v6e
topology: v6e:2x2x1
jax: 0.10.0
libtpu: 0.0.40
codegen_flags: <defaults>
</compile_context>

<pallas_src>
import functools

import jax
import jax.numpy as jnp
import numpy as np
from jax import lax
from jax.experimental import pallas as pl
from jax.experimental.pallas import tpu as pltpu


def _resblock_kernel(x_ref, res_ref,
                     g1_ref, be1_ref,
                     wmix_ref, bmix_ref,
                     g2_ref, be2_ref,
                     wu_ref, bu_ref,
                     wg_ref, bg_ref,
                     w2_ref, b2_ref,
                     h_out_ref, res_out_ref,
                     *, eps: float):
    f32 = jnp.float32

    # ---- Add: residual stream kept in f32 (residual_in_fp32=True) ----------
    resid = x_ref[...].astype(f32) + res_ref[...].astype(f32)          # (TM, D)

    # ---- LN1(resid) -> mixer input ------------------------------------------
    mean1 = jnp.mean(resid, axis=-1, keepdims=True)
    xc1 = resid - mean1
    var1 = jnp.mean(xc1 * xc1, axis=-1, keepdims=True)
    h1 = xc1 * lax.rsqrt(var1 + eps)                                   # EUP rsqrt
    h1 = h1 * g1_ref[...].astype(f32) + be1_ref[...].astype(f32)

    # ---- Mixer: Linear(D, D) on the MXU with f32 accumulation ---------------
    mixer_out = jnp.dot(h1.astype(wmix_ref.dtype), wmix_ref[...],
                        preferred_element_type=f32)
    mixer_out = mixer_out + bmix_ref[...].astype(f32)                  # (TM, D)

    # ---- Add -> LN2: per the PyTorch source (non-fused path) the normalized
    #      sum is what the block RETURNS as `residual`; the MLP consumes the
    #      raw mixer output. --------------------------------------------------
    resid2 = mixer_out + resid
    mean2 = jnp.mean(resid2, axis=-1, keepdims=True)
    xc2 = resid2 - mean2
    var2 = jnp.mean(xc2 * xc2, axis=-1, keepdims=True)
    res_norm = xc2 * lax.rsqrt(var2 + eps)
    res_norm = res_norm * g2_ref[...].astype(f32) + be2_ref[...].astype(f32)
    res_out_ref[...] = res_norm.astype(res_out_ref.dtype)

    # ---- GatedMLP on mixer_out: two (TM,H) dots (no (TM,2H) intermediate,
    #      no lane slicing) -> up * silu(gate) -> fc2. ------------------------
    lhs = mixer_out.astype(wu_ref.dtype)
    up = jnp.dot(lhs, wu_ref[...], preferred_element_type=f32) \
        + bu_ref[...].astype(f32)                                      # (TM, H)
    gate = jnp.dot(lhs, wg_ref[...], preferred_element_type=f32) \
        + bg_ref[...].astype(f32)                                      # (TM, H)
    act = up * (gate * jax.nn.sigmoid(gate))                           # silu -> EUP
    h_out = jnp.dot(act.astype(w2_ref.dtype), w2_ref[...],
                    preferred_element_type=f32) + b2_ref[...].astype(f32)
    h_out_ref[...] = h_out.astype(h_out_ref.dtype)


def _round_up(x: int, m: int) -> int:
    return ((x + m - 1) // m) * m


def _vmem_bytes(tm: int, D: int, H: int,
                x_bytes: int, r_bytes: int, w_bytes: int) -> int:
    # Streamed row tiles, double-buffered: x, residual_in, h_out, res_out(f32).
    stream = 2 * tm * D * (x_bytes + r_bytes + x_bytes + 4)
    # Weights/biases resident (constant index_map) but still double-buffered.
    weights = 2 * ((D * D + 2 * D * H + H * D) + (6 * D + 2 * H)) * w_bytes
    # Live f32 intermediates in the body (rough upper bound).
    interm = tm * (5 * D + 3 * H) * 4
    return stream + weights + interm


def resblock_forward(hidden_states, residual, params, *, eps: float = 1e-5,
                     block_rows: int = 256,
                     vmem_budget_bytes: int = 40 * 1024 * 1024):
    """Fused ResBlock forward. Returns (hidden_states_out, residual_out_f32)."""
    B, L, D = hidden_states.shape
    if residual is None:
        residual = jnp.zeros_like(hidden_states)

    M = B * L
    x2 = hidden_states.reshape(M, D)       # reshape only: free, lane-dense
    r2 = residual.reshape(M, D)

    H = params["w2"].shape[0]
    x_bytes = jnp.dtype(hidden_states.dtype).itemsize
    r_bytes = jnp.dtype(residual.dtype).itemsize
    w_bytes = jnp.dtype(params["w_mix"].dtype).itemsize

    # Row tile: large enough to hide the ~0.35us/step pipeline overhead and
    # feed full MXU passes; multiple of 8 (f32 sublanes); shrunk if the
    # double-buffered tiles + resident weights would blow a v7x-safe budget.
    tm = max(8, _round_up(min(block_rows, M), 8))
    while tm > 8 and _vmem_bytes(tm, D, H, x_bytes, r_bytes, w_bytes) > vmem_budget_bytes:
        tm = max(8, _round_up(tm // 2, 8))
    grid = pl.cdiv(M, tm)   # no wrapper-side pad: ragged edge block is masked

    est = _vmem_bytes(tm, D, H, x_bytes, r_bytes, w_bytes)
    vmem_limit = int(min(100 * 1024 * 1024, max(32 * 1024 * 1024, 2 * est)))

    row_spec = pl.BlockSpec((tm, D), lambda i: (i, 0))

    def pinned(shape):
        # Constant block index -> weight DMA'd once, VMEM-resident across all
        # row tiles (fine at these sizes).
        # TODO(synk): at production D/H, stream w_up/w_gate/w2 over an extra
        # "arbitrary" K grid axis (or use single-buffered weight specs) so
        # 2x weight buffers fit v7x's 64 MiB VMEM.
        return pl.BlockSpec(shape, lambda i: (0, 0))

    kernel = functools.partial(_resblock_kernel, eps=eps)

    h_out, res_out = pl.pallas_call(
        kernel,
        out_shape=(
            jax.ShapeDtypeStruct((M, D), hidden_states.dtype),
            jax.ShapeDtypeStruct((M, D), jnp.float32),
        ),
        grid_spec=pltpu.PrefetchScalarGridSpec(
            num_scalar_prefetch=0,
            grid=(grid,),
            in_specs=[
                row_spec,                              # x
                row_spec,                              # residual in
                pinned((1, D)),                        # gamma1
                pinned((1, D)),                        # beta1
                pinned((D, D)),                        # mixer weight
                pinned((1, D)),                        # mixer bias
                pinned((1, D)),                        # gamma2
                pinned((1, D)),                        # beta2
                pinned((D, H)),                        # fc1 'up' weight
                pinned((1, H)),                        # fc1 'up' bias
                pinned((D, H)),                        # fc1 'gate' weight
                pinned((1, H)),                        # fc1 'gate' bias
                pinned((H, D)),                        # fc2 weight
                pinned((1, D)),                        # fc2 bias
            ],
            out_specs=[row_spec, row_spec],
        ),
        compiler_params=pltpu.CompilerParams(
            dimension_semantics=("parallel",),         # megacore on v7x
            vmem_limit_bytes=vmem_limit),
    )(x2, r2,
      params["gamma1"], params["beta1"],
      params["w_mix"], params["b_mix"],
      params["gamma2"], params["beta2"],
      params["w_up"], params["b_up"],
      params["w_gate"], params["b_gate"],
      params["w2"], params["b2"])

    return h_out.reshape(B, L, D), res_out.reshape(B, L, D)


def resblock_ref(hidden_states, residual, params, eps: float = 1e-5):
    """Pure-JAX reference matching the PyTorch ResBlock forward (f32 math)."""
    f32 = jnp.float32
    if residual is None:
        residual = jnp.zeros_like(hidden_states)
    p = {k: v.astype(f32) for k, v in params.items()}
    resid = hidden_states.astype(f32) + residual.astype(f32)

    def ln(x, g, b):
        m = jnp.mean(x, axis=-1, keepdims=True)
        v = jnp.mean((x - m) ** 2, axis=-1, keepdims=True)
        return (x - m) / jnp.sqrt(v + eps) * g.reshape(-1) + b.reshape(-1)

    h1 = ln(resid, p["gamma1"], p["beta1"])
    mixer_out = h1 @ p["w_mix"] + p["b_mix"].reshape(-1)
    resid2 = mixer_out + resid
    res_out = ln(resid2, p["gamma2"], p["beta2"]).astype(f32)
    up = mixer_out @ p["w_up"] + p["b_up"].reshape(-1)
    gate = mixer_out @ p["w_gate"] + p["b_gate"].reshape(-1)
    h_out = (up * jax.nn.silu(gate)) @ p["w2"] + p["b2"].reshape(-1)
    return h_out.astype(hidden_states.dtype), res_out


if __name__ == "__main__":
    # TODO(synk): mixer_cls is parameterized in the PyTorch module (e.g. a Mamba
    # SSM); it is instantiated here as a Linear(D, D) token-wise mixer, and
    # mlp_cls as GatedMLP with fc1 split into up/gate halves at the param level.
    D, H = 128, 256
    s = 0.05

    def make_params(dtype, keys):
        return dict(
            gamma1=(jnp.ones((1, D)) + s * jax.random.normal(keys[0], (1, D))).astype(dtype),
            beta1=(s * jax.random.normal(keys[1], (1, D))).astype(dtype),
            w_mix=(s * jax.random.normal(keys[2], (D, D))).astype(dtype),
            b_mix=(s * jax.random.normal(keys[3], (1, D))).astype(dtype),
            gamma2=(jnp.ones((1, D)) + s * jax.random.normal(keys[4], (1, D))).astype(dtype),
            beta2=(s * jax.random.normal(keys[5], (1, D))).astype(dtype),
            w_up=(s * jax.random.normal(keys[6], (D, H))).astype(dtype),
            b_up=(s * jax.random.normal(keys[7], (1, H))).astype(dtype),
            w_gate=(s * jax.random.normal(keys[8], (D, H))).astype(dtype),
            b_gate=(s * jax.random.normal(keys[9], (1, H))).astype(dtype),
            w2=(s * jax.random.normal(keys[10], (H, D))).astype(dtype),
            b2=(s * jax.random.normal(keys[11], (1, D))).astype(dtype),
        )

    fwd = jax.jit(resblock_forward)
    fwd_small_tile = jax.jit(lambda x, r, p: resblock_forward(x, r, p, block_rows=8))

    # --- Check 1: f32 everywhere, strict tolerance, single row tile. ---------
    ks = jax.random.split(jax.random.PRNGKey(0), 14)
    B, L = 2, 8
    x = jax.random.normal(ks[12], (B, L, D), jnp.float32)
    res = jax.random.normal(ks[13], (B, L, D), jnp.float32)
    params = make_params(jnp.float32, ks[:12])
    h_out, r_out = fwd(x, res, params)
    jax.block_until_ready((h_out, r_out))
    h_ref, r_ref = resblock_ref(x, res, params)
    np.testing.assert_allclose(np.asarray(h_out), np.asarray(h_ref), rtol=2e-4, atol=2e-4)
    np.testing.assert_allclose(np.asarray(r_out), np.asarray(r_ref), rtol=2e-4, atol=2e-4)

    # --- Check 1b: force a multi-step row grid (exercises pipelining). -------
    h_out2, r_out2 = fwd_small_tile(x, res, params)
    jax.block_until_ready((h_out2, r_out2))
    np.testing.assert_allclose(np.asarray(h_out2), np.asarray(h_ref), rtol=2e-4, atol=2e-4)
    np.testing.assert_allclose(np.asarray(r_out2), np.asarray(r_ref), rtol=2e-4, atol=2e-4)

    # --- Check 2: bf16 activations/weights (f32 residual stream & f32 accum),
    #     ragged M (= 21) to exercise the masked edge block (no wrapper pad). -
    ks2 = jax.random.split(jax.random.PRNGKey(1), 14)
    B2, L2 = 3, 7
    x_bf = jax.random.normal(ks2[12], (B2, L2, D), jnp.float32).astype(jnp.bfloat16)
    res_f32 = jax.random.normal(ks2[13], (B2, L2, D), jnp.float32)
    params_bf = make_params(jnp.bfloat16, ks2[:12])
    h_bf, r_bf = fwd(x_bf, res_f32, params_bf)
    jax.block_until_ready((h_bf, r_bf))
    h_ref2, r_ref2 = resblock_ref(x_bf, res_f32, params_bf)
    np.testing.assert_allclose(np.asarray(h_bf.astype(jnp.float32)),
                               np.asarray(h_ref2.astype(jnp.float32)),
                               rtol=5e-2, atol=5e-2)
    np.testing.assert_allclose(np.asarray(r_bf), np.asarray(r_ref2),
                               rtol=5e-2, atol=5e-2)

    print("KERNEL_OK")
</pallas_src>

<mosaic_0001>
module attributes {stable_mosaic.version = 11 : i64} {
  func.func @_resblock_kernel(%arg0: i32, %arg1: memref<16x128xf32, #tpu.memory_space<vmem>>, %arg2: memref<16x128xf32, #tpu.memory_space<vmem>>, %arg3: memref<1x128xf32, #tpu.memory_space<vmem>>, %arg4: memref<1x128xf32, #tpu.memory_space<vmem>>, %arg5: memref<128x128xf32, #tpu.memory_space<vmem>>, %arg6: memref<1x128xf32, #tpu.memory_space<vmem>>, %arg7: memref<1x128xf32, #tpu.memory_space<vmem>>, %arg8: memref<1x128xf32, #tpu.memory_space<vmem>>, %arg9: memref<128x256xf32, #tpu.memory_space<vmem>>, %arg10: memref<1x256xf32, #tpu.memory_space<vmem>>, %arg11: memref<128x256xf32, #tpu.memory_space<vmem>>, %arg12: memref<1x256xf32, #tpu.memory_space<vmem>>, %arg13: memref<256x128xf32, #tpu.memory_space<vmem>>, %arg14: memref<1x128xf32, #tpu.memory_space<vmem>>, %arg15: memref<16x128xf32, #tpu.memory_space<vmem>>, %arg16: memref<16x128xf32, #tpu.memory_space<vmem>>) attributes {dimension_semantics = [#tpu.dimension_semantics<parallel>], iteration_bounds = array<i64: 1>, scalar_prefetch = 0 : i64, scratch_operands = 0 : i64, tpu.core_type = #tpu.core_type<tc>, window_params = [{transform_indices = @transform_0, window_bounds = array<i64: 16, 128>}, {transform_indices = @transform_1, window_bounds = array<i64: 16, 128>}, {pipeline_mode = #tpu.pipeline_mode<synchronous>, transform_indices = @transform_2, window_bounds = array<i64: 1, 128>}, {pipeline_mode = #tpu.pipeline_mode<synchronous>, transform_indices = @transform_3, window_bounds = array<i64: 1, 128>}, {pipeline_mode = #tpu.pipeline_mode<synchronous>, transform_indices = @transform_4, window_bounds = array<i64: 128, 128>}, {pipeline_mode = #tpu.pipeline_mode<synchronous>, transform_indices = @transform_5, window_bounds = array<i64: 1, 128>}, {pipeline_mode = #tpu.pipeline_mode<synchronous>, transform_indices = @transform_6, window_bounds = array<i64: 1, 128>}, {pipeline_mode = #tpu.pipeline_mode<synchronous>, transform_indices = @transform_7, window_bounds = array<i64: 1, 128>}, {pipeline_mode = #tpu.pipeline_mode<synchronous>, transform_indices = @transform_8, window_bounds = array<i64: 128, 256>}, {pipeline_mode = #tpu.pipeline_mode<synchronous>, transform_indices = @transform_9, window_bounds = array<i64: 1, 256>}, {pipeline_mode = #tpu.pipeline_mode<synchronous>, transform_indices = @transform_10, window_bounds = array<i64: 128, 256>}, {pipeline_mode = #tpu.pipeline_mode<synchronous>, transform_indices = @transform_11, window_bounds = array<i64: 1, 256>}, {pipeline_mode = #tpu.pipeline_mode<synchronous>, transform_indices = @transform_12, window_bounds = array<i64: 256, 128>}, {pipeline_mode = #tpu.pipeline_mode<synchronous>, transform_indices = @transform_13, window_bounds = array<i64: 1, 128>}, {transform_indices = @transform_14, window_bounds = array<i64: 16, 128>}, {transform_indices = @transform_15, window_bounds = array<i64: 16, 128>}]} {
    %c0 = arith.constant 0 : index
    %c0_0 = arith.constant 0 : index
    %0 = vector.load %arg1[%c0, %c0_0] : memref<16x128xf32, #tpu.memory_space<vmem>>, vector<16x128xf32>
    %c0_1 = arith.constant 0 : index
    %c0_2 = arith.constant 0 : index
    %1 = vector.load %arg2[%c0_1, %c0_2] : memref<16x128xf32, #tpu.memory_space<vmem>>, vector<16x128xf32>
    %2 = arith.addf %0, %1 : vector<16x128xf32>
    %cst = arith.constant dense<0.000000e+00> : vector<16xf32>
    %3 = vector.multi_reduction <add>, %2, %cst [1] : vector<16x128xf32> to vector<16xf32>
    %4 = vector.shape_cast %3 : vector<16xf32> to vector<16x1xf32>
    %cst_3 = arith.constant 1.280000e+02 : f32
    %5 = vector.broadcast %cst_3 : f32 to vector<16x1xf32>
    %6 = arith.divf %4, %5 : vector<16x1xf32>
    %7 = vector.broadcast %6 : vector<16x1xf32> to vector<16x128xf32>
    %8 = arith.subf %2, %7 : vector<16x128xf32>
    %9 = arith.mulf %8, %8 : vector<16x128xf32>
    %cst_4 = arith.constant dense<0.000000e+00> : vector<16xf32>
    %10 = vector.multi_reduction <add>, %9, %cst_4 [1] : vector<16x128xf32> to vector<16xf32>
    %11 = vector.shape_cast %10 : vector<16xf32> to vector<16x1xf32>
    %cst_5 = arith.constant 1.280000e+02 : f32
    %12 = vector.broadcast %cst_5 : f32 to vector<16x1xf32>
    %13 = arith.divf %11, %12 : vector<16x1xf32>
    %cst_6 = arith.constant 9.99999974E-6 : f32
    %14 = vector.broadcast %cst_6 : f32 to vector<16x1xf32>
    %15 = arith.addf %13, %14 : vector<16x1xf32>
    %16 = math.rsqrt %15 : vector<16x1xf32>
    %17 = vector.broadcast %16 : vector<16x1xf32> to vector<16x128xf32>
    %18 = arith.mulf %8, %17 : vector<16x128xf32>
    %c0_7 = arith.constant 0 : index
    %c0_8 = arith.constant 0 : index
    %19 = vector.load %arg3[%c0_7, %c0_8] : memref<1x128xf32, #tpu.memory_space<vmem>>, vector<1x128xf32>
    %20 = vector.broadcast %19 : vector<1x128xf32> to vector<16x128xf32>
    %21 = arith.mulf %18, %20 : vector<16x128xf32>
    %c0_9 = arith.constant 0 : index
    %c0_10 = arith.constant 0 : index
    %22 = vector.load %arg4[%c0_9, %c0_10] : memref<1x128xf32, #tpu.memory_space<vmem>>, vector<1x128xf32>
    %23 = vector.broadcast %22 : vector<1x128xf32> to vector<16x128xf32>
    %24 = arith.addf %21, %23 : vector<16x128xf32>
    %c0_11 = arith.constant 0 : index
    %c0_12 = arith.constant 0 : index
    %25 = vector.load %arg5[%c0_11, %c0_12] : memref<128x128xf32, #tpu.memory_space<vmem>>, vector<128x128xf32>
    %cst_13 = arith.constant dense<0.000000e+00> : vector<16x128xf32>
    %26 = tpu.matmul %24, %25, %cst_13 {dimension_numbers = #tpu.dot_dimension_numbers<[1], [0], [0], [1], [0, 0, 1, 1], [], []>} : vector<16x128xf32>, vector<128x128xf32>, vector<16x128xf32> -> vector<16x128xf32>
    %c0_14 = arith.constant 0 : index
    %c0_15 = arith.constant 0 : index
    %27 = vector.load %arg6[%c0_14, %c0_15] : memref<1x128xf32, #tpu.memory_space<vmem>>, vector<1x128xf32>
    %28 = vector.broadcast %27 : vector<1x128xf32> to vector<16x128xf32>
    %29 = arith.addf %26, %28 : vector<16x128xf32>
    %30 = arith.addf %29, %2 : vector<16x128xf32>
    %cst_16 = arith.constant dense<0.000000e+00> : vector<16xf32>
    %31 = vector.multi_reduction <add>, %30, %cst_16 [1] : vector<16x128xf32> to vector<16xf32>
    %32 = vector.shape_cast %31 : vector<16xf32> to vector<16x1xf32>
    %cst_17 = arith.constant 1.280000e+02 : f32
    %33 = vector.broadcast %cst_17 : f32 to vector<16x1xf32>
    %34 = arith.divf %32, %33 : vector<16x1xf32>
    %35 = vector.broadcast %34 : vector<16x1xf32> to vector<16x128xf32>
    %36 = arith.subf %30, %35 : vector<16x128xf32>
    %37 = arith.mulf %36, %36 : vector<16x128xf32>
    %cst_18 = arith.constant dense<0.000000e+00> : vector<16xf32>
    %38 = vector.multi_reduction <add>, %37, %cst_18 [1] : vector<16x128xf32> to vector<16xf32>
    %39 = vector.shape_cast %38 : vector<16xf32> to vector<16x1xf32>
    %cst_19 = arith.constant 1.280000e+02 : f32
    %40 = vector.broadcast %cst_19 : f32 to vector<16x1xf32>
    %41 = arith.divf %39, %40 : vector<16x1xf32>
    %cst_20 = arith.constant 9.99999974E-6 : f32
    %42 = vector.broadcast %cst_20 : f32 to vector<16x1xf32>
    %43 = arith.addf %41, %42 : vector<16x1xf32>
    %44 = math.rsqrt %43 : vector<16x1xf32>
    %45 = vector.broadcast %44 : vector<16x1xf32> to vector<16x128xf32>
    %46 = arith.mulf %36, %45 : vector<16x128xf32>
    %c0_21 = arith.constant 0 : index
    %c0_22 = arith.constant 0 : index
    %47 = vector.load %arg7[%c0_21, %c0_22] : memref<1x128xf32, #tpu.memory_space<vmem>>, vector<1x128xf32>
    %48 = vector.broadcast %47 : vector<1x128xf32> to vector<16x128xf32>
    %49 = arith.mulf %46, %48 : vector<16x128xf32>
    %c0_23 = arith.constant 0 : index
    %c0_24 = arith.constant 0 : index
    %50 = vector.load %arg8[%c0_23, %c0_24] : memref<1x128xf32, #tpu.memory_space<vmem>>, vector<1x128xf32>
    %51 = vector.broadcast %50 : vector<1x128xf32> to vector<16x128xf32>
    %52 = arith.addf %49, %51 : vector<16x128xf32>
    %c0_25 = arith.constant 0 : index
    %c0_26 = arith.constant 0 : index
    %53 = vector.load %arg16[%c0_25, %c0_26] : memref<16x128xf32, #tpu.memory_space<vmem>>, vector<16x128xf32>
    tpu.vector_store %arg16[%c0_25, %c0_26], %52 {strides = array<i32>} : memref<16x128xf32, #tpu.memory_space<vmem>>, vector<16x128xf32>,
    %c0_27 = arith.constant 0 : index
    %c0_28 = arith.constant 0 : index
    %54 = vector.load %arg9[%c0_27, %c0_28] : memref<128x256xf32, #tpu.memory_space<vmem>>, vector<128x256xf32>
    %cst_29 = arith.constant dense<0.000000e+00> : vector<16x256xf32>
    %55 = tpu.matmul %29, %54, %cst_29 {dimension_numbers = #tpu.dot_dimension_numbers<[1], [0], [0], [1], [0, 0, 1, 1], [], []>} : vector<16x128xf32>, vector<128x256xf32>, vector<16x256xf32> -> vector<16x256xf32>
    %c0_30 = arith.constant 0 : index
    %c0_31 = arith.constant 0 : index
    %56 = vector.load %arg10[%c0_30, %c0_31] : memref<1x256xf32, #tpu.memory_space<vmem>>, vector<1x256xf32>
    %57 = vector.broadcast %56 : vector<1x256xf32> to vector<16x256xf32>
    %58 = arith.addf %55, %57 : vector<16x256xf32>
    %c0_32 = arith.constant 0 : index
    %c0_33 = arith.constant 0 : index
    %59 = vector.load %arg11[%c0_32, %c0_33] : memref<128x256xf32, #tpu.memory_space<vmem>>, vector<128x256xf32>
    %cst_34 = arith.constant dense<0.000000e+00> : vector<16x256xf32>
    %60 = tpu.matmul %29, %59, %cst_34 {dimension_numbers = #tpu.dot_dimension_numbers<[1], [0], [0], [1], [0, 0, 1, 1], [], []>} : vector<16x128xf32>, vector<128x256xf32>, vector<16x256xf32> -> vector<16x256xf32>
    %c0_35 = arith.constant 0 : index
    %c0_36 = arith.constant 0 : index
    %61 = vector.load %arg12[%c0_35, %c0_36] : memref<1x256xf32, #tpu.memory_space<vmem>>, vector<1x256xf32>
    %62 = vector.broadcast %61 : vector<1x256xf32> to vector<16x256xf32>
    %63 = arith.addf %60, %62 : vector<16x256xf32>
    %64 = arith.negf %63 : vector<16x256xf32>
    %65 = math.exp %64 : vector<16x256xf32>
    %cst_37 = arith.constant 1.000000e+00 : f32
    %66 = vector.broadcast %cst_37 : f32 to vector<16x256xf32>
    %67 = arith.addf %66, %65 : vector<16x256xf32>
    %68 = arith.divf %66, %67 : vector<16x256xf32>
    %69 = arith.mulf %63, %68 : vector<16x256xf32>
    %70 = arith.mulf %58, %69 : vector<16x256xf32>
    %c0_38 = arith.constant 0 : index
    %c0_39 = arith.constant 0 : index
    %71 = vector.load %arg13[%c0_38, %c0_39] : memref<256x128xf32, #tpu.memory_space<vmem>>, vector<256x128xf32>
    %cst_40 = arith.constant dense<0.000000e+00> : vector<16x128xf32>
    %72 = tpu.matmul %70, %71, %cst_40 {dimension_numbers = #tpu.dot_dimension_numbers<[1], [0], [0], [1], [0, 0, 1, 1], [], []>} : vector<16x256xf32>, vector<256x128xf32>, vector<16x128xf32> -> vector<16x128xf32>
    %c0_41 = arith.constant 0 : index
    %c0_42 = arith.constant 0 : index
    %73 = vector.load %arg14[%c0_41, %c0_42] : memref<1x128xf32, #tpu.memory_space<vmem>>, vector<1x128xf32>
    %74 = vector.broadcast %73 : vector<1x128xf32> to vector<16x128xf32>
    %75 = arith.addf %72, %74 : vector<16x128xf32>
    %c0_43 = arith.constant 0 : index
    %c0_44 = arith.constant 0 : index
    %76 = vector.load %arg15[%c0_43, %c0_44] : memref<16x128xf32, #tpu.memory_space<vmem>>, vector<16x128xf32>
    tpu.vector_store %arg15[%c0_43, %c0_44], %75 {strides = array<i32>} : memref<16x128xf32, #tpu.memory_space<vmem>>, vector<16x128xf32>,
    return
  }
  func.func @transform_0(%arg0: i32) -> (i32, i32) {
    %c0_i32 = arith.constant 0 : i32
    %c0_i32_0 = arith.constant 0 : i32
    return %arg0, %c0_i32 : i32, i32
  }
  func.func @transform_1(%arg0: i32) -> (i32, i32) {
    %c0_i32 = arith.constant 0 : i32
    %c0_i32_0 = arith.constant 0 : i32
    return %arg0, %c0_i32 : i32, i32
  }
  func.func @transform_2(%arg0: i32) -> (i32, i32) {
    %c0_i32 = arith.constant 0 : i32
    %c0_i32_0 = arith.constant 0 : i32
    %c0_i32_1 = arith.constant 0 : i32
    return %c0_i32, %c0_i32_0 : i32, i32
  }
  func.func @transform_3(%arg0: i32) -> (i32, i32) {
    %c0_i32 = arith.constant 0 : i32
    %c0_i32_0 = arith.constant 0 : i32
    %c0_i32_1 = arith.constant 0 : i32
    return %c0_i32, %c0_i32_0 : i32, i32
  }
  func.func @transform_4(%arg0: i32) -> (i32, i32) {
    %c0_i32 = arith.constant 0 : i32
    %c0_i32_0 = arith.constant 0 : i32
    %c0_i32_1 = arith.constant 0 : i32
    return %c0_i32, %c0_i32_0 : i32, i32
  }
  func.func @transform_5(%arg0: i32) -> (i32, i32) {
    %c0_i32 = arith.constant 0 : i32
    %c0_i32_0 = arith.constant 0 : i32
    %c0_i32_1 = arith.constant 0 : i32
    return %c0_i32, %c0_i32_0 : i32, i32
  }
  func.func @transform_6(%arg0: i32) -> (i32, i32) {
    %c0_i32 = arith.constant 0 : i32
    %c0_i32_0 = arith.constant 0 : i32
    %c0_i32_1 = arith.constant 0 : i32
    return %c0_i32, %c0_i32_0 : i32, i32
  }
  func.func @transform_7(%arg0: i32) -> (i32, i32) {
    %c0_i32 = arith.constant 0 : i32
    %c0_i32_0 = arith.constant 0 : i32
    %c0_i32_1 = arith.constant 0 : i32
    return %c0_i32, %c0_i32_0 : i32, i32
  }
  func.func @transform_8(%arg0: i32) -> (i32, i32) {
    %c0_i32 = arith.constant 0 : i32
    %c0_i32_0 = arith.constant 0 : i32
    %c0_i32_1 = arith.constant 0 : i32
    return %c0_i32, %c0_i32_0 : i32, i32
  }
  func.func @transform_9(%arg0: i32) -> (i32, i32) {
    %c0_i32 = arith.constant 0 : i32
    %c0_i32_0 = arith.constant 0 : i32
    %c0_i32_1 = arith.constant 0 : i32
    return %c0_i32, %c0_i32_0 : i32, i32
  }
  func.func @transform_10(%arg0: i32) -> (i32, i32) {
    %c0_i32 = arith.constant 0 : i32
    %c0_i32_0 = arith.constant 0 : i32
    %c0_i32_1 = arith.constant 0 : i32
    return %c0_i32, %c0_i32_0 : i32, i32
  }
  func.func @transform_11(%arg0: i32) -> (i32, i32) {
    %c0_i32 = arith.constant 0 : i32
    %c0_i32_0 = arith.constant 0 : i32
    %c0_i32_1 = arith.constant 0 : i32
    return %c0_i32, %c0_i32_0 : i32, i32
  }
  func.func @transform_12(%arg0: i32) -> (i32, i32) {
    %c0_i32 = arith.constant 0 : i32
    %c0_i32_0 = arith.constant 0 : i32
    %c0_i32_1 = arith.constant 0 : i32
    return %c0_i32, %c0_i32_0 : i32, i32
  }
  func.func @transform_13(%arg0: i32) -> (i32, i32) {
    %c0_i32 = arith.constant 0 : i32
    %c0_i32_0 = arith.constant 0 : i32
    %c0_i32_1 = arith.constant 0 : i32
    return %c0_i32, %c0_i32_0 : i32, i32
  }
  func.func @transform_14(%arg0: i32) -> (i32, i32) {
    %c0_i32 = arith.constant 0 : i32
    %c0_i32_0 = arith.constant 0 : i32
    return %arg0, %c0_i32 : i32, i32
  }
  func.func @transform_15(%arg0: i32) -> (i32, i32) {
    %c0_i32 = arith.constant 0 : i32
    %c0_i32_0 = arith.constant 0 : i32
    return %arg0, %c0_i32 : i32, i32
  }
}

</mosaic_0001>

<bundles_post_ra>
// kernel: resblock_forward.1
= control target key start
LH: loop header
LB: loop body
LE: loop exit
PB: predicated region body
PF: predicated region fallthrough
CT: control target
= control target key end

     0   :  { %21 = vsyncpa [#allocation3], 0  ;;  %s1294_s0 = inlined_call_operand.hbm [shape: f32[16,128], index: 0, kind: input, shape index: {}]   ;;  %s1295_s1 = inlined_call_operand.hbm [shape: f32[16,128], index: 1, kind: input, shape index: {}]   ;;  %s1296_s2 = inlined_call_operand.vmem [shape: f32[1,128], index: 2, kind: input, shape index: {}]   ;;  %s1297_s3 = inlined_call_operand.vmem [shape: f32[1,128], index: 3, kind: input, shape index: {}]   ;;  %s1298_s4 = inlined_call_operand.hbm [shape: f32[128,128], index: 4, kind: input, shape index: {}]   ;;  %s1299_s5 = inlined_call_operand.vmem [shape: f32[1,128], index: 5, kind: input, shape index: {}]   ;;  %s1300_s6 = inlined_call_operand.vmem [shape: f32[1,128], index: 6, kind: input, shape index: {}]   ;;  %s1301_s7 = inlined_call_operand.vmem [shape: f32[1,128], index: 7, kind: input, shape index: {}]   ;;  %s1302_s8 = inlined_call_operand.hbm [shape: f32[128,256], index: 8, kind: input, shape index: {}]   ;;  %s1303_s9 = inlined_call_operand.vmem [shape: f32[1,256], index: 9, kind: input, shape index: {}]   ;;  %s1304_s10 = inlined_call_operand.hbm [shape: f32[128,256], index: 10, kind: input, shape index: {}]   ;;  %s1305_s11 = inlined_call_operand.vmem [shape: f32[1,256], index: 11, kind: input, shape index: {}]   ;;  %s1306_s12 = inlined_call_operand.hbm [shape: f32[256,128], index: 12, kind: input, shape index: {}]   ;;  %s1307_s13 = inlined_call_operand.hbm [shape: f32[1,128], index: 13, kind: input, shape index: {}]   ;;  %s1308_s14 = inlined_call_operand.hbm [shape: f32[16,128], index: 14, kind: output, shape index: {0}]   ;;  %s1309_s15 = inlined_call_operand.hbm [shape: f32[16,128], index: 15, kind: output, shape index: {1}]  }
   0x1   :  { %22 = vsyncpa [#allocation6], 0 }
   0x2   :  { %23 = vsyncpa [#allocation9], 0 }
   0x3   :  { %24 = vsyncpa [#allocation12], 0 }
   0x4   :  { %25 = vsyncpa [#allocation4], 0 }
   0x5   :  { %26 = vsyncpa [#allocation16], 0  ;;  %s1090_s18 = smov [#allocation5]   ;;  %s1091_s20 = smov [#allocation8]  }
   0x6   :  { %s44_s19 = sshll.u32 %s1090_s18, 4  ;;  %s78_s21 = sshll.u32 %s1091_s20, 4  ;;  %s45_s19 = int_to_ptr.vmem [resolvable:$true] %s44_s19  ;;  %s79_s21 = int_to_ptr.vmem [resolvable:$true] %s78_s21 }
   0x7   :  { %s906_s22 = scalar_lea.vmem %s45_s19, 256  ;;  %p911_p1 = scmp.lt.s32.totalorder %s45_s19, %s45_s19 }
   0x8   :  { %p907_p0 = scmp.ne.s32.totalorder %s45_s19, %s906_s22  ;;  %p912_p2 = scmp.lt.s32.totalorder %s906_s22, %s906_s22 }
   0xa   :  { %p913_p3 = por %p912_p2, %p911_p1 }
   0xc   :  { %p914_p4 = pnand %p913_p3, %p907_p0 }
   0xe   :  { %917 = shalt.err (!%p914_p4)
}
   0xf   :  { %s1092_s23 = smov 128   ;;  %s1093_s24 = smov 8  }
  0x10   :  { %50 = dma.hbm_to_vmem [thread:$0]  %s1295_s1, 256, %s45_s19, [#allocation6], %s1092_s23, %s1092_s23, %s1093_s24  }
  0x11   :  { %s926_s27 = scalar_lea.vmem %s79_s21, 4096  ;;  %p931_p6 = scmp.lt.s32.totalorder %s79_s21, %s79_s21 }
  0x12   :  { %p927_p5 = scmp.ne.s32.totalorder %s79_s21, %s926_s27  ;;  %p932_p7 = scmp.lt.s32.totalorder %s926_s27, %s926_s27 }
  0x14   :  { %p933_p8 = por %p932_p7, %p931_p6 }
  0x16   :  { %p934_p9 = pnand %p933_p8, %p927_p5 }
  0x18   :  { %937 = shalt.err (!%p934_p9)
}
  0x19   :  { %s1094_s28 = smov 256   ;;  %s1095_s29 = smov 16  }
  0x1a   :  { %84 = dma.hbm_to_vmem [thread:$0]  %s1302_s8, 4096, %s79_s21, [#allocation9], %s1094_s28, %s1094_s28, %s1095_s29  }
  0x1b   :  { %s1096_s17 = smov [#allocation11]   ;;  %s1097_s20 = smov [#allocation2]  }
  0x1c   :  { %s106_s18 = sshll.u32 %s1096_s17, 4  ;;  %s32_s1 = sshll.u32 %s1097_s20, 4  ;;  %s107_s18 = int_to_ptr.vmem [resolvable:$true] %s106_s18  ;;  %s33_s1 = int_to_ptr.vmem [resolvable:$true] %s32_s1 }
  0x1d   :  { %s946_s19 = scalar_lea.vmem %s107_s18, 4096  ;;  %p951_p11 = scmp.lt.s32.totalorder %s107_s18, %s107_s18 }
  0x1e   :  { %p947_p10 = scmp.ne.s32.totalorder %s107_s18, %s946_s19  ;;  %p952_p12 = scmp.lt.s32.totalorder %s946_s19, %s946_s19 }
  0x20   :  { %p953_p13 = por %p952_p12, %p951_p11 }
  0x22   :  { %p954_p0 = pnand %p953_p13, %p947_p10 }
  0x24   :  { %957 = shalt.err (!%p954_p0)
}
  0x25   :  { %112 = dma.hbm_to_vmem [thread:$0]  %s1306_s12, 4096, %s107_s18, [#allocation12], %s1092_s23, %s1092_s23, %s1093_s24  }
  0x26   :  { %s966_s8 = scalar_lea.vmem %s33_s1, 256  ;;  %p971_p2 = scmp.lt.s32.totalorder %s33_s1, %s33_s1 }
  0x27   :  { %p967_p1 = scmp.ne.s32.totalorder %s33_s1, %s966_s8  ;;  %p972_p3 = scmp.lt.s32.totalorder %s966_s8, %s966_s8 }
  0x29   :  { %p973_p4 = por %p972_p3, %p971_p2 }
  0x2b   :  { %p974_p5 = pnand %p973_p4, %p967_p1 }
  0x2d   :  { %977 = shalt.err (!%p974_p5)
}
  0x2e   :  { %38 = dma.hbm_to_vmem [thread:$0]  %s1294_s0, 256, %s33_s1, [#allocation3], %s1092_s23, %s1092_s23, %s1093_s24  }
  0x2f   :  { %s1098_s27 = smov [#allocation7]   ;;  %s1099_s16 = smov [#allocation10]  }
  0x30   :  { %s60_s30 = sshll.u32 %s1098_s27, 4  ;;  %s92_s17 = sshll.u32 %s1099_s16, 4  ;;  %s61_s30 = int_to_ptr.vmem [resolvable:$true] %s60_s30  ;;  %s93_s17 = int_to_ptr.vmem [resolvable:$true] %s92_s17 }
  0x31   :  { %s986_s12 = scalar_lea.vmem %s61_s30, 2048  ;;  %p991_p7 = scmp.lt.s32.totalorder %s61_s30, %s61_s30 }
  0x32   :  { %p987_p6 = scmp.ne.s32.totalorder %s61_s30, %s986_s12  ;;  %p992_p8 = scmp.lt.s32.totalorder %s986_s12, %s986_s12 }
  0x34   :  { %p993_p9 = por %p992_p8, %p991_p7 }
  0x36   :  { %p994_p10 = pnand %p993_p9, %p987_p6 }
  0x38   :  { %997 = shalt.err (!%p994_p10)
}
  0x39   :  { %66 = dma.hbm_to_vmem [thread:$0]  %s1298_s4, 2048, %s61_s30, [#allocation6], %s1092_s23, %s1092_s23, %s1093_s24  }
  0x3a   :  { %s1006_s0 = scalar_lea.vmem %s93_s17, 4096  ;;  %p1011_p12 = scmp.lt.s32.totalorder %s93_s17, %s93_s17 }
  0x3b   :  { %p1007_p11 = scmp.ne.s32.totalorder %s93_s17, %s1006_s0  ;;  %p1012_p13 = scmp.lt.s32.totalorder %s1006_s0, %s1006_s0 }
  0x3d   :  { %p1013_p0 = por %p1012_p13, %p1011_p12 }
  0x3f   :  { %p1014_p1 = pnand %p1013_p0, %p1007_p11 }
  0x41   :  { %1017 = shalt.err (!%p1014_p1)
}
  0x42   :  { %98 = dma.hbm_to_vmem [thread:$0]  %s1304_s10, 4096, %s93_s17, [#allocation9], %s1094_s28, %s1094_s28, %s1095_s29  }
  0x43   :  { %s1100_s22 = smov [#allocation13]  }
  0x44   :  { %s119_s25 = sshll.u32 %s1100_s22, 4  ;;  %s120_s25 = int_to_ptr.vmem [resolvable:$true] %s119_s25 }
  0x45   :  { %s1026_s8 = scalar_lea.vmem %s120_s25, 16  ;;  %s1030_s4 = scalar_lea.vmem %s120_s25, 32 }
  0x46   :  { %p1027_p2 = scmp.ne.s32.totalorder %s120_s25, %s1026_s8  ;;  %p1031_p3 = scmp.lt.s32.totalorder %s120_s25, %s120_s25 }
  0x47   :  { %p1032_p4 = scmp.lt.s32.totalorder %s1030_s4, %s1026_s8 }
  0x49   :  { %p1033_p5 = por %p1032_p4, %p1031_p3 }
  0x4b   :  { %p1034_p6 = pnand %p1033_p5, %p1027_p2 }
  0x4d   :  { %1037 = shalt.err (!%p1034_p6)
}
  0x4e   :  { %122 = dma.hbm_to_vmem [thread:$0]  %s1307_s13, 16, %s120_s25, [#allocation12]  }
  0x4f   :  { %1078 = dma.done.wait [#allocation3], 256  }
  0x50   :  { %1079 = vsyncadd [#allocation3], 4294967040 }
  0x51   :  { %1080 = dma.done.wait [#allocation6], 2304  }
  0x52   :  { %1081 = vsyncadd [#allocation6], 4294964992 }
  0x53   :  { %1082 = dma.done.wait [#allocation9], 8192  }
  0x54   :  { %1083 = vsyncadd [#allocation9], 4294959104 }
  0x55   :  { %1084 = dma.done.wait [#allocation12], 4112  }
  0x56   :  { %1085 = vsyncadd [#allocation12], 4294963184  ;;  %v144_v0 = vld [vmem:[#allocation2] sm:$0xff]  ;;  %v146_v1 = vld [vmem:[#allocation5] sm:$0xff]  ;;  %s1102_s18 = smov [#allocation15]  }
  0x57   :  { %v145_v2 = vld [vmem:[#allocation2 + $0x8] sm:$0xff]  ;;  %v1223_v3 = vadd.f32 %v146_v1, %v144_v0  ;;  %v147_v4 = vld [vmem:[#allocation5 + $0x8] sm:$0xff]  ;;  %v205_v7 = vld [vmem:[#allocation7 + $0x70] sm:$0xff]  ;;  %s740_s20 = sshll.u32 %s1102_s18, 4  ;;  %s741_s20 = int_to_ptr.vmem [resolvable:$true] %s740_s20 }
  0x58   :  { %v1226_v5 = vadd.f32 %v147_v4, %v145_v2  ;;  %v206_v6 = vld [vmem:[#allocation7 + $0x78] sm:$0xff]  ;;  %v204_v16 = vld [vmem:[#allocation7 + $0x68] sm:$0xff]  ;;  %v203_v17 = vld [vmem:[#allocation7 + $0x60] sm:$0xff]  ;;  %s1038_s0 = scalar_lea.vmem %s741_s20, 256  ;;  %p1043_p8 = scmp.lt.s32.totalorder %s741_s20, %s741_s20 }
  0x59   :  { %150 = vadd.xlane.f32.xlu0 %v1223_v3  ;;  %825 = vmatprep.subr.mxu0 %v206_v6  ;;  %v202_v18 = vld [vmem:[#allocation7 + $0x58] sm:$0xff]  ;;  %v201_v19 = vld [vmem:[#allocation7 + $0x50] sm:$0xff]  ;;  %v200_v20 = vld [vmem:[#allocation7 + $0x48] sm:$0xff]  ;;  %p1039_p7 = scmp.ne.s32.totalorder %s741_s20, %s1038_s0  ;;  %p1044_p9 = scmp.lt.s32.totalorder %s1038_s0, %s1038_s0 }
  0x5a   :  { %826 = vmatpush3.msra.mxu0 %v206_v6  ;;  %v199_v21 = vld [vmem:[#allocation7 + $0x40] sm:$0xff]  ;;  %v198_v22 = vld [vmem:[#allocation7 + $0x38] sm:$0xff]  ;;  %v197_v23 = vld [vmem:[#allocation7 + $0x30] sm:$0xff] }
  0x5b   :  { %827 = vmatprep.subr.mxu0 %v205_v7  ;;  %v196_v24 = vld [vmem:[#allocation7 + $0x28] sm:$0xff]  ;;  %v195_v25 = vld [vmem:[#allocation7 + $0x20] sm:$0xff]  ;;  %v194_v26 = vld [vmem:[#allocation7 + $0x18] sm:$0xff]  ;;  %p1045_p10 = por %p1044_p9, %p1043_p8 }
  0x5c   :  { %828 = vmatpush3.msra.mxu0 %v205_v7  ;;  %v193_v27 = vld [vmem:[#allocation7 + $0x10] sm:$0xff]  ;;  %v192_v28 = vld [vmem:[#allocation7 + $0x8] sm:$0xff]  ;;  %v191_v29 = vld [vmem:[#allocation7] sm:$0xff] }
  0x5d   :  { %152 = vadd.xlane.f32.xlu0 %v1226_v5  ;;  %829 = vmatprep.subr.mxu0 %v204_v16  ;;  %v364_v30 = vld [vmem:[#allocation8 + $0xf8] sm:$0xff]  ;;  %v363_v32 = vld [vmem:[#allocation8 + $0xf0] sm:$0xff]  ;;  %v362_v33 = vld [vmem:[#allocation8 + $0xe8] sm:$0xff]  ;;  %p1046_p11 = pnand %p1045_p10, %p1039_p7 }
  0x5e   :  { %830 = vmatpush3.msra.mxu0 %v204_v16  ;;  %v485_v31 = vld [vmem:[#allocation10 + $0xf8] sm:$0xff]  ;;  %377 = vmatprep.subr.mxu1 %v364_v30  ;;  %v361_v34 = vld [vmem:[#allocation8 + $0xe0] sm:$0xff]  ;;  %v359_v36 = vld [vmem:[#allocation8 + $0xd0] sm:$0xff] }
  0x5f   :  { %831 = vmatprep.subr.mxu0 %v203_v17  ;;  %378 = vmatpush1.msra.mxu1 %v363_v32  ;;  %v360_v35 = vld [vmem:[#allocation8 + $0xd8] sm:$0xff]  ;;  %v358_v37 = vld [vmem:[#allocation8 + $0xc8] sm:$0xff]  ;;  %v357_v38 = vld [vmem:[#allocation8 + $0xc0] sm:$0xff] }
  0x60   :  { %832 = vmatpush3.msra.mxu0 %v203_v17  ;;  %379 = vmatprep.subr.mxu1 %v362_v33  ;;  %v356_v39 = vld [vmem:[#allocation8 + $0xb8] sm:$0xff]  ;;  %v355_v40 = vld [vmem:[#allocation8 + $0xb0] sm:$0xff]  ;;  %v354_v41 = vld [vmem:[#allocation8 + $0xa8] sm:$0xff] }
  0x61   :  { %833 = vmatprep.subr.mxu0 %v202_v18  ;;  %380 = vmatpush1.msra.mxu1 %v361_v34  ;;  %v353_v42 = vld [vmem:[#allocation8 + $0xa0] sm:$0xff]  ;;  %v352_v43 = vld [vmem:[#allocation8 + $0x98] sm:$0xff]  ;;  %v351_v44 = vld [vmem:[#allocation8 + $0x90] sm:$0xff] }
  0x62   :  { %834 = vmatpush3.msra.mxu0 %v202_v18  ;;  %381 = vmatprep.subr.mxu1 %v360_v35  ;;  %v350_v45 = vld [vmem:[#allocation8 + $0x88] sm:$0xff]  ;;  %v349_v46 = vld [vmem:[#allocation8 + $0x80] sm:$0xff]  ;;  %v348_v47 = vld [vmem:[#allocation8 + $0x78] sm:$0xff] }
  0x63   :  { %835 = vmatprep.subr.mxu0 %v201_v19  ;;  %382 = vmatpush1.msra.mxu1 %v359_v36  ;;  %v347_v48 = vld [vmem:[#allocation8 + $0x70] sm:$0xff]  ;;  %v346_v49 = vld [vmem:[#allocation8 + $0x68] sm:$0xff]  ;;  %v345_v50 = vld [vmem:[#allocation8 + $0x60] sm:$0xff] }
  0x64   :  { %836 = vmatpush3.msra.mxu0 %v201_v19  ;;  %383 = vmatprep.subr.mxu1 %v358_v37  ;;  %v344_v51 = vld [vmem:[#allocation8 + $0x58] sm:$0xff]  ;;  %v343_v52 = vld [vmem:[#allocation8 + $0x50] sm:$0xff]  ;;  %v342_v53 = vld [vmem:[#allocation8 + $0x48] sm:$0xff] }
  0x65   :  { %837 = vmatprep.subr.mxu0 %v200_v20  ;;  %384 = vmatpush1.msra.mxu1 %v357_v38  ;;  %v341_v54 = vld [vmem:[#allocation8 + $0x40] sm:$0xff]  ;;  %v340_v55 = vld [vmem:[#allocation8 + $0x38] sm:$0xff]  ;;  %v339_v56 = vld [vmem:[#allocation8 + $0x30] sm:$0xff] }
  0x66   :  { %838 = vmatpush3.msra.mxu0 %v200_v20  ;;  %385 = vmatprep.subr.mxu1 %v356_v39  ;;  %v338_v57 = vld [vmem:[#allocation8 + $0x28] sm:$0xff]  ;;  %v759_v1 = vld [vmem:[%s1296_s2] ss:$0 sm:$0xff]  ;;  %v481_v17 = vld [vmem:[#allocation10 + $0xd8] sm:$0xff] }
  0x67   :  { %839 = vmatprep.subr.mxu0 %v199_v21  ;;  %386 = vmatpush1.msra.mxu1 %v355_v40  ;;  %v760_v4 = vld [vmem:[%s1297_s3] ss:$0 sm:$0xff]  ;;  %v479_v18 = vld [vmem:[#allocation10 + $0xc8] sm:$0xff]  ;;  %v477_v20 = vld [vmem:[#allocation10 + $0xb8] sm:$0xff] }
  0x68   :  { %840 = vmatpush3.msra.mxu0 %v199_v21  ;;  %387 = vmatprep.subr.mxu1 %v354_v41  ;;  %v482_v16 = vld [vmem:[#allocation10 + $0xe0] sm:$0xff]  ;;  %v475_v21 = vld [vmem:[#allocation10 + $0xa8] sm:$0xff]  ;;  %v464_v32 = vld [vmem:[#allocation10 + $0x50] sm:$0xff] }
  0x69   :  { %841 = vmatprep.subr.mxu0 %v198_v22  ;;  %388 = vmatpush1.msra.mxu1 %v353_v42  ;;  %v478_v19 = vld [vmem:[#allocation10 + $0xc0] sm:$0xff]  ;;  %v463_v33 = vld [vmem:[#allocation10 + $0x48] sm:$0xff]  ;;  %v461_v35 = vld [vmem:[#allocation10 + $0x38] sm:$0xff] }
  0x6a   :  { %842 = vmatpush3.msra.mxu0 %v198_v22  ;;  %389 = vmatprep.subr.mxu1 %v352_v43  ;;  %v474_v22 = vld [vmem:[#allocation10 + $0xa0] sm:$0xff]  ;;  %v460_v36 = vld [vmem:[#allocation10 + $0x30] sm:$0xff]  ;;  %v459_v37 = vld [vmem:[#allocation10 + $0x28] sm:$0xff] }
  0x6b   :  { %843 = vmatprep.subr.mxu0 %v197_v23  ;;  %390 = vmatpush1.msra.mxu1 %v351_v44  ;;  %v466_v30 = vld [vmem:[#allocation10 + $0x60] sm:$0xff]  ;;  %v336_v40 = vld [vmem:[#allocation8 + $0x18] sm:$0xff]  ;;  %v335_v42 = vld [vmem:[#allocation8 + $0x10] sm:$0xff] }
  0x6c   :  { %844 = vmatpush3.msra.mxu0 %v197_v23  ;;  %391 = vmatprep.subr.mxu1 %v350_v45  ;;  %v473_v23 = vld [vmem:[#allocation10 + $0x98] sm:$0xff]  ;;  %v462_v34 = vld [vmem:[#allocation10 + $0x40] sm:$0xff]  ;;  %v456_v43 = vld [vmem:[#allocation10 + $0x10] sm:$0xff] }
  0x6d   :  { %845 = vmatprep.subr.mxu0 %v196_v24  ;;  %392 = vmatpush1.msra.mxu1 %v349_v46  ;;  %v337_v38 = vld [vmem:[#allocation8 + $0x20] sm:$0xff]  ;;  %v457_v41 = vld [vmem:[#allocation10 + $0x18] sm:$0xff]  ;;  %v334_v44 = vld [vmem:[#allocation8 + $0x8] sm:$0xff] }
  0x6e   :  { %846 = vmatpush3.msra.mxu0 %v196_v24  ;;  %393 = vmatprep.subr.mxu1 %v348_v47  ;;  %v472_v24 = vld [vmem:[#allocation10 + $0x90] sm:$0xff]  ;;  %v458_v39 = vld [vmem:[#allocation10 + $0x20] sm:$0xff]  ;;  %v455_v45 = vld [vmem:[#allocation10 + $0x8] sm:$0xff] }
  0x6f   :  { %847 = vmatprep.subr.mxu0 %v195_v25  ;;  %394 = vmatpush1.msra.mxu1 %v347_v48  ;;  %v333_v46 = vld [vmem:[#allocation8] sm:$0xff]  ;;  %v1101_v48 = vmov 0.0  }
  0x70   :  { %848 = vmatpush3.msra.mxu0 %v195_v25  ;;  %395 = vmatprep.subr.mxu1 %v346_v49  ;;  %v471_v25 = vld [vmem:[#allocation10 + $0x88] sm:$0xff]  ;;  %v454_v47 = vld [vmem:[#allocation10] sm:$0xff] }
  0x71   :  { %849 = vmatprep.subr.mxu0 %v194_v26  ;;  %396 = vmatpush1.msra.mxu1 %v345_v50  ;;  %v761_v49 = vld [vmem:[%s1299_s5] ss:$0 sm:$0xff] }
  0x72   :  { %850 = vmatpush3.msra.mxu0 %v194_v26  ;;  %397 = vmatprep.subr.mxu1 %v344_v51  ;;  %v470_v26 = vld [vmem:[#allocation10 + $0x80] sm:$0xff] }
  0x73   :  { %851 = vmatprep.subr.mxu0 %v193_v27  ;;  %398 = vmatpush1.msra.mxu1 %v343_v52 }
  0x74   :  { %852 = vmatpush3.msra.mxu0 %v193_v27  ;;  %399 = vmatprep.subr.mxu1 %v342_v53  ;;  %v469_v27 = vld [vmem:[#allocation10 + $0x78] sm:$0xff] }
  0x75   :  { %853 = vmatprep.subr.mxu0 %v192_v28  ;;  %400 = vmatpush1.msra.mxu1 %v341_v54 }
  0x76   :  { %854 = vmatpush3.msra.mxu0 %v192_v28  ;;  %401 = vmatprep.subr.mxu1 %v340_v55  ;;  %v468_v28 = vld [vmem:[#allocation10 + $0x70] sm:$0xff] }
  0x77   :  { %855 = vmatprep.subr.mxu0 %v191_v29  ;;  %402 = vmatpush1.msra.mxu1 %v339_v56  ;;  %v638_v56 = vld [vmem:[#allocation11 + $0xf8] sm:$0xff] }
  0x78   :  { %856 = vmatpush3.msra.mxu0 %v191_v29  ;;  %403 = vmatprep.subr.mxu1 %v338_v57  ;;  %v467_v29 = vld [vmem:[#allocation10 + $0x68] sm:$0xff]  ;;  %v622_v57 = vld [vmem:[#allocation11 + $0x78] sm:$0xff] }
  0x79   :  { %498 = vmatprep.subr.mxu0 %v485_v31  ;;  %v465_v31 = vld [vmem:[#allocation10 + $0x58] sm:$0xff]  ;;  %404 = vmatpush1.msra.mxu1 %v337_v38 }
  0x7a   :  { %405 = vmatprep.subr.mxu1 %v336_v40  ;;  %441 = vmatprep.mubr.f32.mxu1 %v1101_v48 }
  0x7b   :  { %406 = vmatpush1.msra.mxu1 %v335_v42 }
  0x7c   :  { %407 = vmatprep.subr.mxu1 %v334_v44 }
  0x7d   :  { %408 = vmatpush1.msra.mxu1 %v333_v46 }
  0x7e   :  { %787 = vmatprep.subr.mxu1 %v638_v56 }
  0xe2   :  { %v151_v8 = vpop.xlane.xlu0 %150 }
  0xe3   :  { %v155_v9 = vmul.f32 0.0078125, %v151_v8 }
  0xe5   :  { %v1230_v10 = vsub.f32 %v1223_v3, %v155_v9 }
  0xe6   :  { %v153_v11 = vpop.xlane.xlu0 %152 }
  0xe7   :  { %v156_v12 = vmul.f32 0.0078125, %v153_v11  ;;  %v159_v13 = vmul.f32 %v1230_v10, %v1230_v10 }
  0xe9   :  { %v1235_v14 = vsub.f32 %v1226_v5, %v156_v12  ;;  %161 = vadd.xlane.f32.xlu1 %v159_v13  ;;  %v484_v13 = vld [vmem:[#allocation10 + $0xf0] sm:$0xff] }
  0xeb   :  { %v160_v15 = vmul.f32 %v1235_v14, %v1235_v14 }
  0xed   :  { %163 = vadd.xlane.f32.xlu1 %v160_v15  ;;  %v483_v15 = vld [vmem:[#allocation10 + $0xe8] sm:$0xff] }
 0x172   :  { %v162_v58 = vpop.xlane.xlu1 %161 }
 0x173   :  { %v165_v59 = vmul.f32 0.0078125, %v162_v58  ;;  %v637_v58 = vld [vmem:[#allocation11 + $0xf0] sm:$0xff] }
 0x175   :  { %v167_v60 = vadd.f32 1e-05, %v165_v59  ;;  %v636_v59 = vld [vmem:[#allocation11 + $0xe8] sm:$0xff] }
 0x176   :  { %v164_v61 = vpop.xlane.xlu1 %163 }
 0x177   :  { %874 = vrsqrt.f32 %v167_v60  ;;  %v166_v62 = vmul.f32 0.0078125, %v164_v61  ;;  %v620_v60 = vld [vmem:[#allocation11 + $0x68] sm:$0xff]  ;;  %v619_v61 = vld [vmem:[#allocation11 + $0x60] sm:$0xff] }
 0x179   :  { %v168_v63 = vadd.f32 1e-05, %v166_v62  ;;  %v634_v62 = vld [vmem:[#allocation11 + $0xd8] sm:$0xff] }
 0x17b   :  { %876 = vrsqrt.f32 %v168_v63  ;;  %v618_v63 = vld [vmem:[#allocation11 + $0x58] sm:$0xff] }
 0x184   :  { %v875_v0 = vpop.eup %874 }
 0x185   :  { %v171_v2 = vmul.f32 %v875_v0, %v1230_v10  ;;  %v480_v10 = vld [vmem:[#allocation10 + $0xd0] sm:$0xff] }
 0x186   :  { %v633_v0 = vld [vmem:[#allocation11 + $0xd0] sm:$0xff] }
 0x187   :  { %v180_v6 = vmul.f32 %v759_v1, %v171_v2  ;;  %v632_v2 = vld [vmem:[#allocation11 + $0xc8] sm:$0xff] }
 0x188   :  { %v877_v7 = vpop.eup %876 }
 0x189   :  { %v172_v8 = vmul.f32 %v877_v7, %v1235_v14  ;;  %v189_v9 = vadd.f32 %v760_v4, %v180_v6  ;;  %v476_v14 = vld [vmem:[#allocation10 + $0xb0] sm:$0xff]  ;;  %v631_v6 = vld [vmem:[#allocation11 + $0xc0] sm:$0xff] }
 0x18a   :  { %v615_v7 = vld [vmem:[#allocation11 + $0x40] sm:$0xff] }
 0x18b   :  { %v181_v11 = vmul.f32 %v759_v1, %v172_v8  ;;  %857 = vmatprep.mubr.f32.mxu0 %v189_v9  ;;  %v617_v1 = vld [vmem:[#allocation11 + $0x50] sm:$0xff]  ;;  %v630_v8 = vld [vmem:[#allocation11 + $0xb8] sm:$0xff] }
 0x18c   :  { %v614_v9 = vld [vmem:[#allocation11 + $0x38] sm:$0xff] }
 0x18d   :  { %v190_v12 = vadd.f32 %v760_v4, %v181_v11  ;;  %v616_v4 = vld [vmem:[#allocation11 + $0x48] sm:$0xff]  ;;  %v629_v11 = vld [vmem:[#allocation11 + $0xb0] sm:$0xff] }
 0x18f   :  { %858 = vmatmul.mubr.f32.vlgmr.msra.gmra.mxu0 %v190_v12  ;;  %v613_v12 = vld [vmem:[#allocation11 + $0x30] sm:$0xff] }
 0x190   :  { %499 = vmatpush1.msra.mxu0 %v484_v13  ;;  %562 = vmatprep.mubr.f32.mxu0 %v1101_v48  ;;  %v628_v13 = vld [vmem:[#allocation11 + $0xa8] sm:$0xff] }
 0x191   :  { %500 = vmatprep.subr.mxu0 %v483_v15  ;;  %v612_v15 = vld [vmem:[#allocation11 + $0x28] sm:$0xff] }
 0x192   :  { %501 = vmatpush1.msra.mxu0 %v482_v16  ;;  %v627_v16 = vld [vmem:[#allocation11 + $0xa0] sm:$0xff] }
 0x193   :  { %502 = vmatprep.subr.mxu0 %v481_v17  ;;  %v611_v17 = vld [vmem:[#allocation11 + $0x20] sm:$0xff] }
 0x194   :  { %503 = vmatpush1.msra.mxu0 %v480_v10  ;;  %v626_v10 = vld [vmem:[#allocation11 + $0x98] sm:$0xff] }
 0x195   :  { %504 = vmatprep.subr.mxu0 %v479_v18  ;;  %v610_v18 = vld [vmem:[#allocation11 + $0x18] sm:$0xff] }
 0x196   :  { %505 = vmatpush1.msra.mxu0 %v478_v19  ;;  %v625_v19 = vld [vmem:[#allocation11 + $0x90] sm:$0xff] }
 0x197   :  { %506 = vmatprep.subr.mxu0 %v477_v20  ;;  %v609_v20 = vld [vmem:[#allocation11 + $0x10] sm:$0xff] }
 0x198   :  { %507 = vmatpush1.msra.mxu0 %v476_v14  ;;  %v624_v14 = vld [vmem:[#allocation11 + $0x88] sm:$0xff] }
 0x199   :  { %508 = vmatprep.subr.mxu0 %v475_v21  ;;  %v608_v21 = vld [vmem:[#allocation11 + $0x8] sm:$0xff] }
 0x19a   :  { %509 = vmatpush1.msra.mxu0 %v474_v22  ;;  %v623_v22 = vld [vmem:[#allocation11 + $0x80] sm:$0xff] }
 0x19b   :  { %510 = vmatprep.subr.mxu0 %v473_v23  ;;  %v607_v23 = vld [vmem:[#allocation11] sm:$0xff] }
 0x19c   :  { %511 = vmatpush1.msra.mxu0 %v472_v24 }
 0x19d   :  { %512 = vmatprep.subr.mxu0 %v471_v25 }
 0x19e   :  { %513 = vmatpush1.msra.mxu0 %v470_v26 }
 0x19f   :  { %514 = vmatprep.subr.mxu0 %v469_v27 }
 0x1a0   :  { %515 = vmatpush1.msra.mxu0 %v468_v28 }
 0x1a1   :  { %516 = vmatprep.subr.mxu0 %v467_v29 }
 0x1a2   :  { %517 = vmatpush1.msra.mxu0 %v466_v30 }
 0x1a3   :  { %518 = vmatprep.subr.mxu0 %v465_v31 }
 0x1a4   :  { %519 = vmatpush1.msra.mxu0 %v464_v32  ;;  %v367_v32 = vlaneseq }
 0x1a5   :  { %520 = vmatprep.subr.mxu0 %v463_v33 }
 0x1a6   :  { %521 = vmatpush1.msra.mxu0 %v462_v34  ;;  %v368_v33 = vshrl.u32 %v367_v32, 7 }
 0x1a7   :  { %522 = vmatprep.subr.mxu0 %v461_v35  ;;  %v486_v35 = vld [vmem:[%s1305_s11] sm:$0x3] }
 0x1a8   :  { %523 = vmatpush1.msra.mxu0 %v460_v36  ;;  %v369_v34 = vsub.s32 0, %v368_v33  ;;  %v373_v36 = vsub.s32 1, %v368_v33 }
 0x1a9   :  { %524 = vmatprep.subr.mxu0 %v459_v37 }
 0x1aa   :  { %525 = vmatpush1.msra.mxu0 %v458_v39  ;;  %v491_v37 = vrot.slane %v486_v35, %v369_v34  ;;  %v495_v38 = vrot.slane %v486_v35, %v373_v36 }
 0x1ab   :  { %526 = vmatprep.subr.mxu0 %v457_v41 }
 0x1ac   :  { %527 = vmatpush1.msra.mxu0 %v456_v43 }
 0x1ad   :  { %528 = vmatprep.subr.mxu0 %v455_v45 }
 0x1ae   :  { %529 = vmatpush1.msra.mxu0 %v454_v47 }
 0x24f   :  { %v859_v50 = vpop.f32.mrf.mxu0 }
 0x250   :  { %v286_v51 = vadd.f32 %v859_v50, %v761_v49 }
 0x251   :  { %v280_v52 = vpop.f32.mrf.mxu0 }
 0x252   :  { %v281_v53 = vadd.f32 %v761_v49, %v280_v52  ;;  %v1251_v54 = vadd.f32 %v286_v51, %v1226_v5  ;;  %v621_v5 = vld [vmem:[#allocation11 + $0x70] sm:$0xff] }
 0x254   :  { %293 = vadd.xlane.f32.xlu1 %v1251_v54  ;;  %442 = vmatmul.mubr.f32.vlgmr.msra.gmra.mxu1 %v281_v53  ;;  %v1255_v55 = vadd.f32 %v281_v53, %v1223_v3  ;;  %v635_v3 = vld [vmem:[#allocation11 + $0xe0] sm:$0xff] }
 0x255   :  { %563 = vmatmul.mubr.f32.vlgmr.msra.gmra.mxu0 %v281_v53  ;;  %447 = vmatprep.mubr.f32.mxu1 %v1101_v48 }
 0x256   :  { %291 = vadd.xlane.f32.xlu0 %v1255_v55  ;;  %568 = vmatprep.mubr.f32.mxu0 %v1101_v48 }
 0x257   :  { %788 = vmatpush3.msra.mxu1 %v622_v57 }
 0x258   :  { %448 = vmatmul.mubr.f32.gmra.mxu1 %v286_v51  ;;  %789 = vmatprep.subr.mxu1 %v637_v58 }
 0x259   :  { %569 = vmatmul.mubr.f32.gmra.mxu0 %v286_v51  ;;  %790 = vmatpush3.msra.mxu1 %v621_v5 }
 0x25a   :  { %791 = vmatprep.subr.mxu1 %v636_v59 }
 0x25b   :  { %792 = vmatpush3.msra.mxu1 %v620_v60  ;;  %v365_v60 = vld [vmem:[%s1303_s9] sm:$0x3] }
 0x25c   :  { %793 = vmatprep.subr.mxu1 %v635_v3  ;;  %v374_v3 = vrot.slane %v365_v60, %v373_v36 }
 0x25d   :  { %794 = vmatpush3.msra.mxu1 %v619_v61 }
 0x25e   :  { %795 = vmatprep.subr.mxu1 %v634_v62  ;;  %v370_v62 = vrot.slane %v365_v60, %v369_v34 }
 0x25f   :  { %796 = vmatpush3.msra.mxu1 %v618_v63 }
 0x260   :  { %797 = vmatprep.subr.mxu1 %v633_v0 }
 0x261   :  { %798 = vmatpush3.msra.mxu1 %v617_v1 }
 0x262   :  { %799 = vmatprep.subr.mxu1 %v632_v2 }
 0x263   :  { %800 = vmatpush3.msra.mxu1 %v616_v4 }
 0x264   :  { %801 = vmatprep.subr.mxu1 %v631_v6 }
 0x265   :  { %802 = vmatpush3.msra.mxu1 %v615_v7 }
 0x266   :  { %803 = vmatprep.subr.mxu1 %v630_v8 }
 0x267   :  { %804 = vmatpush3.msra.mxu1 %v614_v9 }
 0x268   :  { %805 = vmatprep.subr.mxu1 %v629_v11 }
 0x269   :  { %806 = vmatpush3.msra.mxu1 %v613_v12 }
 0x26a   :  { %807 = vmatprep.subr.mxu1 %v628_v13 }
 0x26b   :  { %808 = vmatpush3.msra.mxu1 %v612_v15 }
 0x26c   :  { %809 = vmatprep.subr.mxu1 %v627_v16 }
 0x26d   :  { %810 = vmatpush3.msra.mxu1 %v611_v17 }
 0x26e   :  { %811 = vmatprep.subr.mxu1 %v626_v10 }
 0x26f   :  { %812 = vmatpush3.msra.mxu1 %v610_v18 }
 0x270   :  { %813 = vmatprep.subr.mxu1 %v625_v19 }
 0x271   :  { %814 = vmatpush3.msra.mxu1 %v609_v20 }
 0x272   :  { %815 = vmatprep.subr.mxu1 %v624_v14 }
 0x273   :  { %816 = vmatpush3.msra.mxu1 %v608_v21 }
 0x274   :  { %817 = vmatprep.subr.mxu1 %v623_v22 }
 0x275   :  { %818 = vmatpush3.msra.mxu1 %v607_v23 }
 0x2dd   :  { %v294_v24 = vpop.xlane.xlu1 %293 }
 0x2de   :  { %v296_v25 = vmul.f32 0.0078125, %v294_v24 }
 0x2df   :  { %v292_v26 = vpop.xlane.xlu0 %291 }
 0x2e0   :  { %v1259_v27 = vsub.f32 %v1251_v54, %v296_v25  ;;  %v295_v28 = vmul.f32 0.0078125, %v292_v26  ;;  %v762_v25 = vld [vmem:[%s1300_s6] ss:$0 sm:$0xff] }
 0x2e2   :  { %v1262_v29 = vsub.f32 %v1255_v55, %v295_v28  ;;  %v300_v30 = vmul.f32 %v1259_v27, %v1259_v27 }
 0x2e4   :  { %303 = vadd.xlane.f32.xlu1 %v300_v30  ;;  %v299_v31 = vmul.f32 %v1262_v29, %v1262_v29  ;;  %v763_v30 = vld [vmem:[%s1301_s7] ss:$0 sm:$0xff] }
 0x2e6   :  { %301 = vadd.xlane.f32.xlu0 %v299_v31 }
 0x314   :  { %v443_v5 = vpop.f32.mrf.mxu1 }
 0x315   :  { %v564_v39 = vpop.f32.mrf.mxu0  ;;  %v444_v7 = vadd.f32 %v443_v5, %v370_v62 }
 0x316   :  { %v565_v40 = vadd.f32 %v564_v39, %v491_v37  ;;  %v445_v59 = vpop.f32.mrf.mxu1 }
 0x317   :  { %v566_v41 = vpop.f32.mrf.mxu0  ;;  %v446_v2 = vadd.f32 %v445_v59, %v374_v3 }
 0x318   :  { %v764_v42 = vmul.f32 -1.442695, %v565_v40  ;;  %v567_v43 = vadd.f32 %v566_v41, %v495_v38  ;;  %v449_v63 = vpop.f32.mrf.mxu1 }
 0x319   :  { %v570_v44 = vpop.f32.mrf.mxu0  ;;  %v450_v17 = vadd.f32 %v449_v63, %v370_v62 }
 0x31a   :  { %878 = vpow2.f32 %v764_v42  ;;  %v765_v45 = vmul.f32 -1.442695, %v567_v43  ;;  %v571_v46 = vadd.f32 %v570_v44, %v491_v37  ;;  %v451_v8 = vpop.f32.mrf.mxu1 }
 0x31b   :  { %v572_v47 = vpop.f32.mrf.mxu0  ;;  %v452_v15 = vadd.f32 %v451_v8, %v374_v3 }
 0x31c   :  { %880 = vpow2.f32 %v765_v45  ;;  %v766_v48 = vmul.f32 -1.442695, %v571_v46  ;;  %v573_v49 = vadd.f32 %v572_v47, %v495_v38 }
 0x31e   :  { %882 = vpow2.f32 %v766_v48  ;;  %v767_v50 = vmul.f32 -1.442695, %v573_v49 }
 0x320   :  { %884 = vpow2.f32 %v767_v50 }
 0x327   :  { %v879_v51 = vpop.eup %878 }
 0x328   :  { %v587_v52 = vadd.f32 1.0, %v879_v51 }
 0x329   :  { %v881_v53 = vpop.eup %880 }
 0x32a   :  { %886 = vrcp.f32 %v587_v52  ;;  %v588_v54 = vadd.f32 1.0, %v881_v53 }
 0x32b   :  { %v883_v55 = vpop.eup %882 }
 0x32c   :  { %888 = vrcp.f32 %v588_v54  ;;  %v589_v56 = vadd.f32 1.0, %v883_v55 }
 0x32d   :  { %v885_v57 = vpop.eup %884 }
 0x32e   :  { %890 = vrcp.f32 %v589_v56  ;;  %v590_v58 = vadd.f32 1.0, %v885_v57 }
 0x330   :  { %892 = vrcp.f32 %v590_v58 }
 0x337   :  { %v887_v61 = vpop.eup %886 }
 0x338   :  { %v599_v1 = vmul.f32 %v887_v61, %v565_v40 }
 0x339   :  { %v889_v0 = vpop.eup %888 }
 0x33a   :  { %v600_v4 = vmul.f32 %v889_v0, %v567_v43  ;;  %v603_v12 = vmul.f32 %v599_v1, %v444_v7 }
 0x33b   :  { %v891_v6 = vpop.eup %890 }
 0x33c   :  { %v604_v9 = vmul.f32 %v600_v4, %v446_v2  ;;  %v601_v13 = vmul.f32 %v891_v6, %v571_v46 }
 0x33d   :  { %v893_v11 = vpop.eup %892 }
 0x33e   :  { %v602_v16 = vmul.f32 %v893_v11, %v573_v49  ;;  %710 = vmatprep.mubr.f32.mxu1 %v604_v9  ;;  %v605_v18 = vmul.f32 %v601_v13, %v450_v17 }
 0x33f   :  { %711 = vmatmul.mubr.f32.vlgmr.msra.gmra.mxu1 %v603_v12 }
 0x340   :  { %v606_v10 = vmul.f32 %v602_v16, %v452_v15 }
 0x342   :  { %715 = vmatprep.mubr.f32.mxu1 %v606_v10 }
 0x343   :  { %716 = vmatmul.mubr.f32.gmra.mxu1 %v605_v18 }
 0x36d   :  { %v304_v19 = vpop.xlane.xlu1 %303 }
 0x36e   :  { %v306_v20 = vmul.f32 0.0078125, %v304_v19 }
 0x36f   :  { %v302_v14 = vpop.xlane.xlu0 %301 }
 0x370   :  { %v308_v21 = vadd.f32 1e-05, %v306_v20  ;;  %v305_v22 = vmul.f32 0.0078125, %v302_v14 }
 0x372   :  { %894 = vrsqrt.f32 %v308_v21  ;;  %v307_v23 = vadd.f32 1e-05, %v305_v22 }
 0x374   :  { %896 = vrsqrt.f32 %v307_v23 }
 0x37f   :  { %v895_v24 = vpop.eup %894 }
 0x380   :  { %v312_v26 = vmul.f32 %v895_v24, %v1259_v27 }
 0x381   :  { %v897_v28 = vpop.eup %896 }
 0x382   :  { %v311_v31 = vmul.f32 %v897_v28, %v1262_v29  ;;  %v321_v32 = vmul.f32 %v762_v25, %v312_v26 }
 0x384   :  { %v320_v33 = vmul.f32 %v762_v25, %v311_v31  ;;  %v330_v34 = vadd.f32 %v763_v30, %v321_v32 }
 0x386   :  { %v329_v35 = vadd.f32 %v763_v30, %v320_v33  ;;  %332 = vst [vmem:[#allocation15 + $0x8] sm:$0xff] %v330_v34 }
 0x388   :  { %331 = vst [vmem:[#allocation15] sm:$0xff] %v329_v35 }
 0x389   :  { %1049 = shalt.err (!%p1046_p11)
}
 0x38a   :  { %746 = dma.vmem_to_hbm [thread:$0]  %s741_s20, 256, %s1309_s15, [#allocation16], %s1092_s23, %s1092_s23, %s1093_s24   ;;  %v768_v29 = vld [vmem:[#allocation13] ss:$0 sm:$0xff] }
 0x38b   :  { %s1103_s1 = smov [#allocation14]  }
 0x38c   :  { %s728_s19 = sshll.u32 %s1103_s1, 4  ;;  %s729_s19 = int_to_ptr.vmem [resolvable:$true] %s728_s19 }
 0x38d   :  { %s1058_s22 = scalar_lea.vmem %s729_s19, 256  ;;  %p1063_p13 = scmp.lt.s32.totalorder %s729_s19, %s729_s19 }
 0x38e   :  { %p1059_p12 = scmp.ne.s32.totalorder %s729_s19, %s1058_s22  ;;  %p1064_p0 = scmp.lt.s32.totalorder %s1058_s22, %s1058_s22 }
 0x390   :  { %p1065_p1 = por %p1064_p0, %p1063_p13 }
 0x392   :  { %p1066_p2 = pnand %p1065_p1, %p1059_p12 }
 0x3ff   :  { %v819_v27 = vpop.f32.mrf.mxu1 }
 0x401   :  { %v820_v36 = vpop.f32.mrf.mxu1 }
 0x402   :  { %v821_v37 = vadd.f32 %v820_v36, %v819_v27 }
 0x403   :  { %v822_v38 = vpop.f32.mrf.mxu1 }
 0x404   :  { %v713_v39 = vadd.f32 %v821_v37, %v768_v29 }
 0x405   :  { %v823_v40 = vpop.f32.mrf.mxu1 }
 0x406   :  { %721 = vst [vmem:[#allocation14] sm:$0xff] %v713_v39  ;;  %v824_v41 = vadd.f32 %v823_v40, %v822_v38 }
 0x408   :  { %v718_v42 = vadd.f32 %v824_v41, %v768_v29 }
 0x40a   :  { %722 = vst [vmem:[#allocation14 + $0x8] sm:$0xff] %v718_v42 }
 0x40b   :  { %1069 = shalt.err (!%p1066_p2)
}
 0x40c   :  { %734 = dma.vmem_to_hbm [thread:$0]  %s729_s19, 256, %s1308_s14, [#allocation4], %s1092_s23, %s1092_s23, %s1093_s24  }
 0x40d   :  { %1086 = dma.done.wait [#allocation4], 256  }
 0x40e   :  { %1087 = vsyncadd [#allocation4], 4294967040 }
 0x40f   :  { %1088 = dma.done.wait [#allocation16], 256  }
 0x410   :  { %1089 = vsyncadd [#allocation16], 4294967040 }
 0x411   :  { %753 = vsyncpa [#allocation3], 1 }
 0x412   :  { %754 = vsyncpa [#allocation6], 1 }
 0x413   :  { %755 = vsyncpa [#allocation9], 1 }
 0x414   :  { %756 = vsyncpa [#allocation12], 1 }
 0x415   :  { %757 = vsyncpa [#allocation4], 1 }
 0x416   :  { %758 = vsyncpa [#allocation16], 1 }

</bundles_post_ra>
